<compile_context>
chip_gen: v7x
topology: tpu7x:2x2x1
jax: 0.10.0
libtpu: 0.0.40
codegen_flags: <defaults>
</compile_context>

<pallas_src>
import functools

import jax
import jax.numpy as jnp
from jax.experimental import pallas as pl
from jax.experimental.pallas import tpu as pltpu


@functools.lru_cache(maxsize=None)
def _vmem_limit():
    """Generation-aware scoped-VMEM budget.

    ~82% of physical VMEM: ~105 MiB on v5e/v6e (128 MiB physical) so a whole
    bi-LSTM layer's weights + gate slab stay resident, ~52 MiB on v7x (64 MiB
    physical).  Falls back to a conservative 48 MiB if the query fails."""
    try:
        cap = int(pltpu.get_tpu_info().vmem_capacity_bytes)
    except Exception:   # non-TPU / older jax fallback
        cap = 64 * 1024 * 1024
    return min(int(cap * 0.82), 112 * 1024 * 1024)


# ----------------------------------------------------------------------------
# Fused 3-linear MLP body: Linear -> BN(eval) -> ReLU -> Linear -> BN -> ReLU -> Linear
# Shared by feFinal and output_layers.  Weights arrive bf16; bias / BN affine f32.
# ----------------------------------------------------------------------------
def _mlp3_kernel(x_ref, w1_ref, b1_ref, s1_ref, t1_ref,
                 w2_ref, b2_ref, s2_ref, t2_ref,
                 w3_ref, b3_ref, o_ref):
    bf16 = jnp.bfloat16
    x = x_ref[...].astype(bf16)
    h = jnp.dot(x, w1_ref[...], preferred_element_type=jnp.float32) + b1_ref[...]
    h = jnp.maximum(h * s1_ref[...] + t1_ref[...], 0.0)           # BN (eval) + ReLU
    h = jnp.dot(h.astype(bf16), w2_ref[...],
                preferred_element_type=jnp.float32) + b2_ref[...]
    h = jnp.maximum(h * s2_ref[...] + t2_ref[...], 0.0)           # BN (eval) + ReLU
    h = jnp.dot(h.astype(bf16), w3_ref[...],
                preferred_element_type=jnp.float32) + b3_ref[...]
    o_ref[...] = h.astype(o_ref.dtype)


def mlp3_rows(x2d, params, *, out_dtype=jnp.float32):
    """Row-tiled 3-layer MLP on a (rows, F) input.

    Used both for feFinal (batch folded into M -> full-height MXU tiles, output
    stored bf16) and for output_layers (f32 logits)."""
    w3 = params[8]
    rows, feat = x2d.shape
    dout = w3.shape[1]
    tile_m = rows if rows <= 256 else 256
    grid = (pl.cdiv(rows, tile_m),)
    wmap = lambda i: (0, 0)
    in_specs = [pl.BlockSpec((tile_m, feat), lambda i: (i, 0))]
    in_specs += [pl.BlockSpec(p.shape, wmap) for p in params]
    out_specs = pl.BlockSpec((tile_m, dout), lambda i: (i, 0))
    return pl.pallas_call(
        _mlp3_kernel,
        out_shape=jax.ShapeDtypeStruct((rows, dout), out_dtype),
        grid=grid,
        in_specs=in_specs,
        out_specs=out_specs,
        compiler_params=pltpu.CompilerParams(
            dimension_semantics=("parallel",),
            vmem_limit_bytes=_vmem_limit()),
    )(x2d, *params)


# ----------------------------------------------------------------------------
# Fused bidirectional LSTM layer: one pallas_call, whole sequence in VMEM.
# x rows are time-major: row t*B + b (B already padded to a multiple of 8).
# Gate order (i, f, g, o) as in PyTorch.
# ----------------------------------------------------------------------------
def _bilstm_kernel(x_ref, wih_ref, b_ref, whhf_ref, whhb_ref, out_ref,
                   gx_ref, oacc_ref, *, hidden, T, B):
    H = hidden
    bf16 = jnp.bfloat16

    # Phase 1: input projection for ALL timesteps and BOTH directions as ONE MXU
    # matmul (bias folded in).  gx columns: [fwd i,f,g,o | bwd i,f,g,o].
    # Kept f32 so the per-step 8-row dynamic slices below stay native-tile loads.
    # TODO(synk): for very long sequences (rows*8H f32 > VMEM budget) or when wih
    # (32 MiB at Din=2H=2048) must be streamed, chunk phase 1 over T/K with
    # pltpu.emit_pipeline and keep only head+tail gate chunks resident; on v7x,
    # additionally split the fwd/bwd chains across the two TensorCores.
    gx_ref[...] = jnp.dot(x_ref[...].astype(bf16), wih_ref[...],
                          preferred_element_type=jnp.float32) + b_ref[...]

    def cell(g, c_prev):
        i = jax.nn.sigmoid(g[:, 0 * H:1 * H])
        f = jax.nn.sigmoid(g[:, 1 * H:2 * H])
        u = jnp.tanh(g[:, 2 * H:3 * H])
        o = jax.nn.sigmoid(g[:, 3 * H:4 * H])
        c = f * c_prev + i * u
        return o * jnp.tanh(c), c

    # Phase 2: serial recurrence — only the small h @ W_hh matmul per step.
    # W_hh refs are read at the dot (VMEM matmul operands), never materialized.
    def step(t, carry):
        h_f, c_f, h_b, c_b = carry
        rf = pl.multiple_of(t * B, B)               # fwd rows: timestep t
        rb = pl.multiple_of((T - 1 - t) * B, B)     # bwd rows: timestep T-1-t
        g_f = gx_ref[pl.ds(rf, B), 0:4 * H] + jnp.dot(
            h_f.astype(bf16), whhf_ref[...], preferred_element_type=jnp.float32)
        g_b = gx_ref[pl.ds(rb, B), 4 * H:8 * H] + jnp.dot(
            h_b.astype(bf16), whhb_ref[...], preferred_element_type=jnp.float32)
        h_f, c_f = cell(g_f, c_f)
        h_b, c_b = cell(g_b, c_b)
        oacc_ref[pl.ds(rf, B), 0:H] = h_f           # fwd half of timestep t
        oacc_ref[pl.ds(rb, B), H:2 * H] = h_b       # bwd half of timestep T-1-t
        return h_f, c_f, h_b, c_b

    z = jnp.zeros((B, H), jnp.float32)
    jax.lax.fori_loop(0, T, step, (z, z, z, z),
                      unroll=True if T <= 8 else 2)

    # Single bulk cast: f32 recurrence accumulator -> bf16 HBM output slab.
    out_ref[...] = oacc_ref[...].astype(out_ref.dtype)


def bilstm_layer(x2d, layer_params, *, hidden, T, B):
    """One fused bidirectional LSTM layer.  x2d: (T*B, Din) time-major rows (bf16)."""
    assert hidden % 128 == 0, "hidden must be a multiple of 128 (lane-aligned gates)"
    assert B % 8 == 0, "padded batch must be a multiple of 8 (sublane-aligned rows)"
    wih, bias, whh_f, whh_b = layer_params
    rows = x2d.shape[0]
    return pl.pallas_call(
        functools.partial(_bilstm_kernel, hidden=hidden, T=T, B=B),
        out_shape=jax.ShapeDtypeStruct((rows, 2 * hidden), jnp.bfloat16),
        scratch_shapes=[pltpu.VMEM((rows, 8 * hidden), jnp.float32),   # gate slab
                        pltpu.VMEM((rows, 2 * hidden), jnp.float32)],  # f32 out acc
        compiler_params=pltpu.CompilerParams(vmem_limit_bytes=_vmem_limit()),
    )(x2d, wih, bias, whh_f, whh_b)


# ----------------------------------------------------------------------------
# Full ApD forward
# ----------------------------------------------------------------------------
def apd_forward(x, params):
    B, T, F = x.shape
    H = params["hidden"]
    # Pad batch to a multiple of 8 once: every per-step row window in the LSTM
    # recurrence then lands on sublane-tile boundaries.  Padded rows are zeros and
    # never mix with valid rows (all ops are row-wise).
    B_pad = ((B + 7) // 8) * 8
    if B_pad != B:
        x = jnp.pad(x, ((0, B_pad - B), (0, 0), (0, 0)))
    # One XLA transpose to time-major rows (row = t*B_pad + b): batch folds into the
    # fe-MLP matmul M dimension -> full-height MXU tiles, no per-batch grid steps.
    x_tm = jnp.transpose(x, (1, 0, 2)).reshape(T * B_pad, F)
    h = mlp3_rows(x_tm, params["fe"], out_dtype=jnp.bfloat16)       # (T*B_pad, E) bf16
    for layer in params["lstm"]:                                    # fused bi-LSTM stack
        h = bilstm_layer(h, layer, hidden=H, T=T, B=B_pad)          # (T*B_pad, 2H) bf16
    last = h[(T - 1) * B_pad:]                                      # last frame == x[:, -1]
    logits = mlp3_rows(last, params["out"], out_dtype=jnp.float32)  # (B_pad, noclasses)
    return logits[:B]


# ----------------------------------------------------------------------------
# Deterministic parameter init (bf16 matmul weights, f32 bias / BN / cell math)
# ----------------------------------------------------------------------------
def init_linear(key, din, dout):
    kw, kb = jax.random.split(key)
    lim = 1.0 / jnp.sqrt(din)
    w = jax.random.uniform(kw, (din, dout), jnp.float32, -lim, lim)
    b = jax.random.uniform(kb, (1, dout), jnp.float32, -lim, lim)
    return w, b


def init_bn(key, dim, eps=1e-5):
    k1, k2, k3 = jax.random.split(key, 3)
    gamma = 1.0 + 0.1 * jax.random.normal(k1, (1, dim), jnp.float32)
    beta = 0.1 * jax.random.normal(k2, (1, dim), jnp.float32)
    mean = 0.1 * jax.random.normal(k3, (1, dim), jnp.float32)
    var = jnp.ones((1, dim), jnp.float32)
    scale = gamma / jnp.sqrt(var + eps)
    shift = beta - mean * scale
    return scale, shift


def init_mlp3(key, d_in, d_h1, d_h2, d_out):
    k1, k2, k3, k4, k5 = jax.random.split(key, 5)
    w1, b1 = init_linear(k1, d_in, d_h1)
    s1, t1 = init_bn(k2, d_h1)
    w2, b2 = init_linear(k3, d_h1, d_h2)
    s2, t2 = init_bn(k4, d_h2)
    w3, b3 = init_linear(k5, d_h2, d_out)
    return (w1.astype(jnp.bfloat16), b1, s1, t1,
            w2.astype(jnp.bfloat16), b2, s2, t2,
            w3.astype(jnp.bfloat16), b3)


def init_lstm_dir(key, din, hidden):
    k1, k2, k3, k4 = jax.random.split(key, 4)
    lim = 1.0 / jnp.sqrt(hidden)
    wih = jax.random.uniform(k1, (din, 4 * hidden), jnp.float32, -lim, lim)
    whh = jax.random.uniform(k2, (hidden, 4 * hidden), jnp.float32, -lim, lim)
    b_ih = jax.random.uniform(k3, (1, 4 * hidden), jnp.float32, -lim, lim)
    b_hh = jax.random.uniform(k4, (1, 4 * hidden), jnp.float32, -lim, lim)
    return wih, whh, b_ih + b_hh


def init_bilstm_layer(key, din, hidden):
    kf, kb = jax.random.split(key)
    wih_f, whh_f, b_f = init_lstm_dir(kf, din, hidden)
    wih_b, whh_b, b_b = init_lstm_dir(kb, din, hidden)
    wih = jnp.concatenate([wih_f, wih_b], axis=1).astype(jnp.bfloat16)   # (Din, 8H)
    bias = jnp.concatenate([b_f, b_b], axis=1)                           # (1, 8H) f32
    return (wih, bias, whh_f.astype(jnp.bfloat16), whh_b.astype(jnp.bfloat16))


# ----------------------------------------------------------------------------
# Pure-JAX reference (mirrors the same bf16-matmul / f32-accumulate / bf16
# inter-layer activation semantics)
# ----------------------------------------------------------------------------
def ref_mlp3(x, params):
    w1, b1, s1, t1, w2, b2, s2, t2, w3, b3 = params
    bf16 = jnp.bfloat16
    h = jnp.dot(x.astype(bf16), w1, preferred_element_type=jnp.float32) + b1
    h = jnp.maximum(h * s1 + t1, 0.0)
    h = jnp.dot(h.astype(bf16), w2, preferred_element_type=jnp.float32) + b2
    h = jnp.maximum(h * s2 + t2, 0.0)
    return jnp.dot(h.astype(bf16), w3, preferred_element_type=jnp.float32) + b3


def ref_bilstm_layer(x2d, layer_params, H, T, B):
    wih, bias, whh_f, whh_b = layer_params
    bf16 = jnp.bfloat16
    gx = jnp.dot(x2d.astype(bf16), wih, preferred_element_type=jnp.float32) + bias
    gx = gx.reshape(T, B, 8 * H)

    def cell(g, c_prev):
        i = jax.nn.sigmoid(g[:, 0 * H:1 * H])
        f = jax.nn.sigmoid(g[:, 1 * H:2 * H])
        u = jnp.tanh(g[:, 2 * H:3 * H])
        o = jax.nn.sigmoid(g[:, 3 * H:4 * H])
        c = f * c_prev + i * u
        return o * jnp.tanh(c), c

    def make_step(whh, col0):
        def step(carry, g_row):
            h, c = carry
            g = g_row[:, col0:col0 + 4 * H] + jnp.dot(
                h.astype(bf16), whh, preferred_element_type=jnp.float32)
            h, c = cell(g, c)
            return (h, c), h
        return step

    z = jnp.zeros((B, H), jnp.float32)
    _, hs_f = jax.lax.scan(make_step(whh_f, 0), (z, z), gx)
    _, hs_b = jax.lax.scan(make_step(whh_b, 4 * H), (z, z), gx[::-1])
    out = jnp.concatenate([hs_f, hs_b[::-1]], axis=-1)    # (T, B, 2H)
    return out.reshape(T * B, 2 * H).astype(bf16)


def ref_forward(x, params):
    B, T, F = x.shape
    H = params["hidden"]
    x_tm = jnp.transpose(x, (1, 0, 2)).reshape(T * B, F)
    h = ref_mlp3(x_tm, params["fe"]).astype(jnp.bfloat16)
    for layer in params["lstm"]:
        h = ref_bilstm_layer(h, layer, H, T, B)
    return ref_mlp3(h[(T - 1) * B:], params["out"])


# ----------------------------------------------------------------------------
if __name__ == "__main__":
    # Small synthetic hyperparameters consistent with the module structure
    # (real model: noFeatures=2048, feHidden=1024, visEmb=256, hiddenDim=1024).
    # hiddenDim / visEmb kept multiples of 128 so gate slices / output halves are
    # lane-aligned (the bilstm wrapper asserts this).
    B, T = 2, 8                    # batch, noFrames
    noFeatures = 32                # stand-in for resnet.fc.in_features
    feHidden, visEmb = 64, 128
    hiddenDim, lstmLayers = 128, 3
    clfHidden, noclasses = 32, 5

    root = jax.random.PRNGKey(0)
    k_x, k_fe, k_out, k_lstm = jax.random.split(root, 4)

    params = {
        "hidden": hiddenDim,
        "fe": init_mlp3(k_fe, noFeatures, feHidden, feHidden // 2, visEmb),
        "out": init_mlp3(k_out, 2 * hiddenDim, hiddenDim, clfHidden, noclasses),
        "lstm": [],
    }
    lkeys = jax.random.split(k_lstm, lstmLayers)
    for layer in range(lstmLayers):
        din = visEmb if layer == 0 else 2 * hiddenDim
        params["lstm"].append(init_bilstm_layer(lkeys[layer], din, hiddenDim))

    x = jax.random.normal(k_x, (B, T, noFeatures), jnp.float32)

    out = jax.block_until_ready(apd_forward(x, params))
    assert out.shape == (B, noclasses), out.shape

    ref = jax.block_until_ready(ref_forward(x, params))
    assert jnp.allclose(out, ref, atol=2e-2, rtol=2e-2), (out, ref)

    # TODO(synk): resnet50 feature_extractor is defined but never used in forward();
    # Dropout / BatchNorm are implemented in eval mode (identity / folded affine).
    print("KERNEL_OK")
</pallas_src>

<mosaic_0001>
module attributes {stable_mosaic.version = 11 : i64} {
  func.func @_mlp3_kernel(%arg0: i32, %arg1: memref<64x32xf32, #tpu.memory_space<vmem>>, %arg2: memref<32x64xbf16, #tpu.memory_space<vmem>>, %arg3: memref<1x64xf32, #tpu.memory_space<vmem>>, %arg4: memref<1x64xf32, #tpu.memory_space<vmem>>, %arg5: memref<1x64xf32, #tpu.memory_space<vmem>>, %arg6: memref<64x32xbf16, #tpu.memory_space<vmem>>, %arg7: memref<1x32xf32, #tpu.memory_space<vmem>>, %arg8: memref<1x32xf32, #tpu.memory_space<vmem>>, %arg9: memref<1x32xf32, #tpu.memory_space<vmem>>, %arg10: memref<32x128xbf16, #tpu.memory_space<vmem>>, %arg11: memref<1x128xf32, #tpu.memory_space<vmem>>, %arg12: memref<64x128xbf16, #tpu.memory_space<vmem>>) attributes {dimension_semantics = [#tpu.dimension_semantics<parallel>], iteration_bounds = array<i64: 1>, scalar_prefetch = 0 : i64, scratch_operands = 0 : i64, tpu.core_type = #tpu.core_type<tc>, window_params = [{transform_indices = @transform_0, window_bounds = array<i64: 64, 32>}, {pipeline_mode = #tpu.pipeline_mode<synchronous>, transform_indices = @transform_1, window_bounds = array<i64: 32, 64>}, {pipeline_mode = #tpu.pipeline_mode<synchronous>, transform_indices = @transform_2, window_bounds = array<i64: 1, 64>}, {pipeline_mode = #tpu.pipeline_mode<synchronous>, transform_indices = @transform_3, window_bounds = array<i64: 1, 64>}, {pipeline_mode = #tpu.pipeline_mode<synchronous>, transform_indices = @transform_4, window_bounds = array<i64: 1, 64>}, {pipeline_mode = #tpu.pipeline_mode<synchronous>, transform_indices = @transform_5, window_bounds = array<i64: 64, 32>}, {pipeline_mode = #tpu.pipeline_mode<synchronous>, transform_indices = @transform_6, window_bounds = array<i64: 1, 32>}, {pipeline_mode = #tpu.pipeline_mode<synchronous>, transform_indices = @transform_7, window_bounds = array<i64: 1, 32>}, {pipeline_mode = #tpu.pipeline_mode<synchronous>, transform_indices = @transform_8, window_bounds = array<i64: 1, 32>}, {pipeline_mode = #tpu.pipeline_mode<synchronous>, transform_indices = @transform_9, window_bounds = array<i64: 32, 128>}, {pipeline_mode = #tpu.pipeline_mode<synchronous>, transform_indices = @transform_10, window_bounds = array<i64: 1, 128>}, {transform_indices = @transform_11, window_bounds = array<i64: 64, 128>}]} {
    %c0 = arith.constant 0 : index
    %c0_0 = arith.constant 0 : index
    %0 = vector.load %arg1[%c0, %c0_0] : memref<64x32xf32, #tpu.memory_space<vmem>>, vector<64x32xf32>
    %1 = arith.truncf %0 : vector<64x32xf32> to vector<64x32xbf16>
    %c0_1 = arith.constant 0 : index
    %c0_2 = arith.constant 0 : index
    %2 = vector.load %arg2[%c0_1, %c0_2] : memref<32x64xbf16, #tpu.memory_space<vmem>>, vector<32x64xbf16>
    %cst = arith.constant dense<0.000000e+00> : vector<64x64xf32>
    %3 = tpu.matmul %1, %2, %cst {dimension_numbers = #tpu.dot_dimension_numbers<[1], [0], [0], [1], [0, 0, 1, 1], [], []>} : vector<64x32xbf16>, vector<32x64xbf16>, vector<64x64xf32> -> vector<64x64xf32>
    %c0_3 = arith.constant 0 : index
    %c0_4 = arith.constant 0 : index
    %4 = vector.load %arg3[%c0_3, %c0_4] : memref<1x64xf32, #tpu.memory_space<vmem>>, vector<1x64xf32>
    %5 = vector.broadcast %4 : vector<1x64xf32> to vector<64x64xf32>
    %6 = arith.addf %3, %5 : vector<64x64xf32>
    %c0_5 = arith.constant 0 : index
    %c0_6 = arith.constant 0 : index
    %7 = vector.load %arg4[%c0_5, %c0_6] : memref<1x64xf32, #tpu.memory_space<vmem>>, vector<1x64xf32>
    %8 = vector.broadcast %7 : vector<1x64xf32> to vector<64x64xf32>
    %9 = arith.mulf %6, %8 : vector<64x64xf32>
    %c0_7 = arith.constant 0 : index
    %c0_8 = arith.constant 0 : index
    %10 = vector.load %arg5[%c0_7, %c0_8] : memref<1x64xf32, #tpu.memory_space<vmem>>, vector<1x64xf32>
    %11 = vector.broadcast %10 : vector<1x64xf32> to vector<64x64xf32>
    %12 = arith.addf %9, %11 : vector<64x64xf32>
    %cst_9 = arith.constant 0.000000e+00 : f32
    %13 = vector.broadcast %cst_9 : f32 to vector<64x64xf32>
    %14 = arith.maximumf %12, %13 : vector<64x64xf32>
    %15 = arith.truncf %14 : vector<64x64xf32> to vector<64x64xbf16>
    %c0_10 = arith.constant 0 : index
    %c0_11 = arith.constant 0 : index
    %16 = vector.load %arg6[%c0_10, %c0_11] : memref<64x32xbf16, #tpu.memory_space<vmem>>, vector<64x32xbf16>
    %cst_12 = arith.constant dense<0.000000e+00> : vector<64x32xf32>
    %17 = tpu.matmul %15, %16, %cst_12 {dimension_numbers = #tpu.dot_dimension_numbers<[1], [0], [0], [1], [0, 0, 1, 1], [], []>} : vector<64x64xbf16>, vector<64x32xbf16>, vector<64x32xf32> -> vector<64x32xf32>
    %c0_13 = arith.constant 0 : index
    %c0_14 = arith.constant 0 : index
    %18 = vector.load %arg7[%c0_13, %c0_14] : memref<1x32xf32, #tpu.memory_space<vmem>>, vector<1x32xf32>
    %19 = vector.broadcast %18 : vector<1x32xf32> to vector<64x32xf32>
    %20 = arith.addf %17, %19 : vector<64x32xf32>
    %c0_15 = arith.constant 0 : index
    %c0_16 = arith.constant 0 : index
    %21 = vector.load %arg8[%c0_15, %c0_16] : memref<1x32xf32, #tpu.memory_space<vmem>>, vector<1x32xf32>
    %22 = vector.broadcast %21 : vector<1x32xf32> to vector<64x32xf32>
    %23 = arith.mulf %20, %22 : vector<64x32xf32>
    %c0_17 = arith.constant 0 : index
    %c0_18 = arith.constant 0 : index
    %24 = vector.load %arg9[%c0_17, %c0_18] : memref<1x32xf32, #tpu.memory_space<vmem>>, vector<1x32xf32>
    %25 = vector.broadcast %24 : vector<1x32xf32> to vector<64x32xf32>
    %26 = arith.addf %23, %25 : vector<64x32xf32>
    %cst_19 = arith.constant 0.000000e+00 : f32
    %27 = vector.broadcast %cst_19 : f32 to vector<64x32xf32>
    %28 = arith.maximumf %26, %27 : vector<64x32xf32>
    %29 = arith.truncf %28 : vector<64x32xf32> to vector<64x32xbf16>
    %c0_20 = arith.constant 0 : index
    %c0_21 = arith.constant 0 : index
    %30 = vector.load %arg10[%c0_20, %c0_21] : memref<32x128xbf16, #tpu.memory_space<vmem>>, vector<32x128xbf16>
    %cst_22 = arith.constant dense<0.000000e+00> : vector<64x128xf32>
    %31 = tpu.matmul %29, %30, %cst_22 {dimension_numbers = #tpu.dot_dimension_numbers<[1], [0], [0], [1], [0, 0, 1, 1], [], []>} : vector<64x32xbf16>, vector<32x128xbf16>, vector<64x128xf32> -> vector<64x128xf32>
    %c0_23 = arith.constant 0 : index
    %c0_24 = arith.constant 0 : index
    %32 = vector.load %arg11[%c0_23, %c0_24] : memref<1x128xf32, #tpu.memory_space<vmem>>, vector<1x128xf32>
    %33 = vector.broadcast %32 : vector<1x128xf32> to vector<64x128xf32>
    %34 = arith.addf %31, %33 : vector<64x128xf32>
    %35 = arith.truncf %34 : vector<64x128xf32> to vector<64x128xbf16>
    %c0_25 = arith.constant 0 : index
    %c0_26 = arith.constant 0 : index
    %36 = vector.load %arg12[%c0_25, %c0_26] : memref<64x128xbf16, #tpu.memory_space<vmem>>, vector<64x128xbf16>
    tpu.vector_store %arg12[%c0_25, %c0_26], %35 {strides = array<i32>} : memref<64x128xbf16, #tpu.memory_space<vmem>>, vector<64x128xbf16>,
    return
  }
  func.func @transform_0(%arg0: i32) -> (i32, i32) {
    %c0_i32 = arith.constant 0 : i32
    %c0_i32_0 = arith.constant 0 : i32
    return %arg0, %c0_i32 : i32, i32
  }
  func.func @transform_1(%arg0: i32) -> (i32, i32) {
    %c0_i32 = arith.constant 0 : i32
    %c0_i32_0 = arith.constant 0 : i32
    %c0_i32_1 = arith.constant 0 : i32
    return %c0_i32, %c0_i32_0 : i32, i32
  }
  func.func @transform_2(%arg0: i32) -> (i32, i32) {
    %c0_i32 = arith.constant 0 : i32
    %c0_i32_0 = arith.constant 0 : i32
    %c0_i32_1 = arith.constant 0 : i32
    return %c0_i32, %c0_i32_0 : i32, i32
  }
  func.func @transform_3(%arg0: i32) -> (i32, i32) {
    %c0_i32 = arith.constant 0 : i32
    %c0_i32_0 = arith.constant 0 : i32
    %c0_i32_1 = arith.constant 0 : i32
    return %c0_i32, %c0_i32_0 : i32, i32
  }
  func.func @transform_4(%arg0: i32) -> (i32, i32) {
    %c0_i32 = arith.constant 0 : i32
    %c0_i32_0 = arith.constant 0 : i32
    %c0_i32_1 = arith.constant 0 : i32
    return %c0_i32, %c0_i32_0 : i32, i32
  }
  func.func @transform_5(%arg0: i32) -> (i32, i32) {
    %c0_i32 = arith.constant 0 : i32
    %c0_i32_0 = arith.constant 0 : i32
    %c0_i32_1 = arith.constant 0 : i32
    return %c0_i32, %c0_i32_0 : i32, i32
  }
  func.func @transform_6(%arg0: i32) -> (i32, i32) {
    %c0_i32 = arith.constant 0 : i32
    %c0_i32_0 = arith.constant 0 : i32
    %c0_i32_1 = arith.constant 0 : i32
    return %c0_i32, %c0_i32_0 : i32, i32
  }
  func.func @transform_7(%arg0: i32) -> (i32, i32) {
    %c0_i32 = arith.constant 0 : i32
    %c0_i32_0 = arith.constant 0 : i32
    %c0_i32_1 = arith.constant 0 : i32
    return %c0_i32, %c0_i32_0 : i32, i32
  }
  func.func @transform_8(%arg0: i32) -> (i32, i32) {
    %c0_i32 = arith.constant 0 : i32
    %c0_i32_0 = arith.constant 0 : i32
    %c0_i32_1 = arith.constant 0 : i32
    return %c0_i32, %c0_i32_0 : i32, i32
  }
  func.func @transform_9(%arg0: i32) -> (i32, i32) {
    %c0_i32 = arith.constant 0 : i32
    %c0_i32_0 = arith.constant 0 : i32
    %c0_i32_1 = arith.constant 0 : i32
    return %c0_i32, %c0_i32_0 : i32, i32
  }
  func.func @transform_10(%arg0: i32) -> (i32, i32) {
    %c0_i32 = arith.constant 0 : i32
    %c0_i32_0 = arith.constant 0 : i32
    %c0_i32_1 = arith.constant 0 : i32
    return %c0_i32, %c0_i32_0 : i32, i32
  }
  func.func @transform_11(%arg0: i32) -> (i32, i32) {
    %c0_i32 = arith.constant 0 : i32
    %c0_i32_0 = arith.constant 0 : i32
    return %arg0, %c0_i32 : i32, i32
  }
}

</mosaic_0001>

<bundles_post_ra>
// kernel: tpu_custom_call.1
= control target key start
LH: loop header
LB: loop body
LE: loop exit
PB: predicated region body
PF: predicated region fallthrough
CT: control target
= control target key end

     0   :  { %vm75_vm0 = vcmask 261120   ;;  %s827_s0 = inlined_call_operand.vmem [shape: f32[64,32], index: 0, kind: input, shape index: {}]   ;;  %s828_s1 = inlined_call_operand.vmem [shape: bf16[32,64], index: 1, kind: input, shape index: {}]   ;;  %s829_s2 = inlined_call_operand.vmem [shape: f32[1,64], index: 2, kind: input, shape index: {}]   ;;  %s830_s3 = inlined_call_operand.vmem [shape: f32[1,64], index: 3, kind: input, shape index: {}]   ;;  %s831_s4 = inlined_call_operand.vmem [shape: f32[1,64], index: 4, kind: input, shape index: {}]   ;;  %s832_s5 = inlined_call_operand.vmem [shape: bf16[64,32], index: 5, kind: input, shape index: {}]   ;;  %s833_s6 = inlined_call_operand.vmem [shape: f32[1,32], index: 6, kind: input, shape index: {}]   ;;  %s834_s7 = inlined_call_operand.vmem [shape: f32[1,32], index: 7, kind: input, shape index: {}]   ;;  %s835_s8 = inlined_call_operand.vmem [shape: f32[1,32], index: 8, kind: input, shape index: {}]   ;;  %s836_s9 = inlined_call_operand.vmem [shape: bf16[32,128], index: 9, kind: input, shape index: {}]   ;;  %s837_s10 = inlined_call_operand.vmem [shape: f32[1,128], index: 10, kind: input, shape index: {}]   ;;  %s838_s11 = inlined_call_operand.hbm [shape: bf16[64,128], index: 11, kind: output, shape index: {}]  }
   0x1   :  { %v639_v0 = vld [vmem:[%s828_s1] sm:$0xff]   ;;  %v640_v1 = vld [vmem:[%s828_s1 + $0x8] sm:$0xff]   ;;  %v42_v5 = vld [vmem:[%s827_s0 + $0x10] sm:$0xff] }
   0x2   :  { %596 = vmatprep.subr.bf16.mxu0 %v639_v0  ;;  %v40_v2 = vld [vmem:[%s827_s0] sm:$0xff]  ;;  %v41_v3 = vld [vmem:[%s827_s0 + $0x8] sm:$0xff]  ;;  %v43_v6 = vld [vmem:[%s827_s0 + $0x18] sm:$0xff] }
   0x3   :  { %597 = vmatpush3.bf16.msra.mxu0 %v639_v0  ;;  %v48_v4 = vpack.c.bf16 %v41_v3, %v40_v2  ;;  %v44_v7 = vld [vmem:[%s827_s0 + $0x20] sm:$0xff]  ;;  %v45_v8 = vld [vmem:[%s827_s0 + $0x28] sm:$0xff]  ;;  %v49_v10 = vpack.c.bf16 %v43_v6, %v42_v5 }
   0x4   :  { %598 = vmatprep.subr.bf16.mxu0 %v640_v1  ;;  %v641_v9 = vld [vmem:[%s832_s5] sm:$0xff]   ;;  %v50_v11 = vpack.c.bf16 %v45_v8, %v44_v7 }
   0x5   :  { %600 = vmatprep.mubr.msk.bf16.mxu0 %vm75_vm0, %v48_v4  ;;  %608 = vmatprep.subr.bf16.mxu1 %v641_v9 }
   0x6   :  { %609 = vmatpush3.bf16.msra.mxu1 %v641_v9 }
   0x7   :  { %599 = vmatpush3.bf16.msra.mxu0 %v640_v1 }
   0x8   :  { %16 = vsyncpa [#allocation3], 0  ;;  %v46_v12 = vld [vmem:[%s827_s0 + $0x30] sm:$0xff]  ;;  %v47_v13 = vld [vmem:[%s827_s0 + $0x38] sm:$0xff]  ;;  %vm234_vm1 = vcmask 523264  }
   0x9   :  { %v51_v14 = vpack.c.bf16 %v47_v13, %v46_v12  ;;  %v642_v15 = vld [vmem:[%s832_s5 + $0x8] sm:$0xff]   ;;  %v643_v16 = vld [vmem:[%s832_s5 + $0x10] sm:$0xff]   ;;  %v644_v17 = vld [vmem:[%s832_s5 + $0x18] sm:$0xff]  }
   0xa   :  { %601 = vmatmul.mubr.msk.bf16.vlgmr.msra.gmra.mrb[0].mxu0 %vm75_vm0, %v49_v10  ;;  %610 = vmatprep.subr.bf16.mxu1 %v642_v15  ;;  %v645_v18 = vld [vmem:[%s836_s9] sm:$0xff]   ;;  %v646_v2 = vld [vmem:[%s836_s9 + $0x8] sm:$0xff]  }
   0xb   :  { %604 = vmatprep.mubr.msk.bf16.mxu0 %vm75_vm0, %v50_v11  ;;  %611 = vmatpush3.bf16.msra.mxu1 %v642_v15  ;;  %v510_v19 = vld [vmem:[%s829_s2] ss:$0 sm:$0xff] }
   0xc   :  { %612 = vmatprep.subr.bf16.mxu1 %v643_v16  ;;  %624 = vmatprep.subr.bf16.mxu0 %v645_v18  ;;  %v517_v21 = vld [vmem:[%s830_s3] ss:$0 sm:$0xff] }
   0xd   :  { %625 = vmatpush3.bf16.msra.mxu0 %v645_v18  ;;  %v518_v24 = vld [vmem:[%s831_s4] ss:$0 sm:$0xff] }
   0xe   :  { %626 = vmatprep.subr.bf16.mxu0 %v646_v2  ;;  %v519_v3 = vld [vmem:[%s833_s6] ss:$0 sm:$0xff] }
   0xf   :  { %613 = vmatpush3.bf16.msra.mxu1 %v643_v16  ;;  %v528_v5 = vld [vmem:[%s834_s7] ss:$0 sm:$0xff] }
  0x10   :  { %614 = vmatprep.subr.bf16.mxu1 %v644_v17  ;;  %v529_v8 = vld [vmem:[%s835_s8] ss:$0 sm:$0xff]  ;;  %s671_s8 = smov [#allocation2]  }
  0x11   :  { %627 = vmatpush3.bf16.msra.mxu0 %v646_v2  ;;  %s499_s9 = sshll.u32 %s671_s8, 4  ;;  %s500_s9 = int_to_ptr.vmem [resolvable:$true] %s499_s9 }
  0x12   :  { %605 = vmatmul.mubr.msk.bf16.gmra.mrb[4].mxu0 %vm75_vm0, %v51_v14  ;;  %p652_p1 = scmp.lt.s32.totalorder %s500_s9, %s500_s9 }
  0x13   :  { %615 = vmatpush3.bf16.msra.mxu1 %v644_v17 }
  0xdd   :  { %v602_v20 = vpop.f32.mrb[0].mxu0 }
  0xde   :  { %v131_v22 = vadd.f32 %v602_v20, %v510_v19  ;;  %v122_v23 = vpop.f32.mrb[1].mxu0 }
  0xdf   :  { %v123_v25 = vadd.f32 %v510_v19, %v122_v23  ;;  %v603_v26 = vpop.f32.mrb[2].mxu0 }
  0xe0   :  { %v162_v27 = vmul.f32 %v517_v21, %v131_v22  ;;  %v134_v28 = vadd.f32 %v603_v26, %v510_v19  ;;  %v125_v29 = vpop.f32.mrb[3].mxu0 }
  0xe1   :  { %v160_v30 = vmul.f32 %v517_v21, %v123_v25  ;;  %v126_v31 = vadd.f32 %v510_v19, %v125_v29 }
  0xe2   :  { %v177_v32 = vadd.f32 %v518_v24, %v162_v27  ;;  %v163_v33 = vmul.f32 %v517_v21, %v134_v28 }
  0xe3   :  { %v161_v34 = vmul.f32 %v517_v21, %v126_v31  ;;  %v175_v35 = vadd.f32 %v518_v24, %v160_v30 }
  0xe4   :  { %v178_v36 = vadd.f32 %v518_v24, %v163_v33  ;;  %v185_v39 = vmax.f32 %v177_v32, 0.0 }
  0xe5   :  { %v606_v37 = vpop.f32.mrb[4].mxu0  ;;  %v176_v38 = vadd.f32 %v518_v24, %v161_v34  ;;  %v183_v45 = vmax.f32 %v175_v35, 0.0 }
  0xe6   :  { %v186_v40 = vmax.f32 %v178_v36, 0.0  ;;  %v147_v41 = vadd.f32 %v606_v37, %v510_v19  ;;  %v138_v42 = vpop.f32.mrb[5].mxu0 }
  0xe7   :  { %v139_v43 = vadd.f32 %v510_v19, %v138_v42  ;;  %v607_v44 = vpop.f32.mrb[6].mxu0  ;;  %v184_v46 = vmax.f32 %v176_v38, 0.0 }
  0xe8   :  { %v192_v47 = vpack.c.bf16 %v186_v40, %v185_v39  ;;  %v166_v48 = vmul.f32 %v517_v21, %v147_v41  ;;  %v150_v49 = vadd.f32 %v607_v44, %v510_v19  ;;  %v141_v50 = vpop.f32.mrb[7].mxu0 }
  0xe9   :  { %v164_v51 = vmul.f32 %v517_v21, %v139_v43  ;;  %v142_v52 = vadd.f32 %v510_v19, %v141_v50  ;;  %v191_v53 = vpack.c.bf16 %v184_v46, %v183_v45 }
  0xea   :  { %v181_v54 = vadd.f32 %v518_v24, %v166_v48  ;;  %v167_v55 = vmul.f32 %v517_v21, %v150_v49 }
  0xeb   :  { %v179_v56 = vadd.f32 %v518_v24, %v164_v51  ;;  %v165_v57 = vmul.f32 %v517_v21, %v142_v52  ;;  %616 = vmatprep.mubr.msk.bf16.mxu1 %vm234_vm1, %v191_v53  ;;  %v530_v51 = vld [vmem:[%s837_s10] ss:$0 sm:$0xff]  ;;  %s647_s10 = scalar_lea.vmem %s500_s9, 512 }
  0xec   :  { %v182_v58 = vadd.f32 %v518_v24, %v167_v55  ;;  %617 = vmatmul.mubr.msk.bf16.vlgmr.msra.gmra.mrb[0].mxu1 %vm234_vm1, %v192_v47  ;;  %v189_v60 = vmax.f32 %v181_v54, 0.0  ;;  %p648_p0 = scmp.ne.s32.totalorder %s500_s9, %s647_s10  ;;  %p653_p2 = scmp.lt.s32.totalorder %s647_s10, %s647_s10 }
  0xed   :  { %v180_v59 = vadd.f32 %v518_v24, %v165_v57  ;;  %v187_v62 = vmax.f32 %v179_v56, 0.0 }
  0xee   :  { %v190_v61 = vmax.f32 %v182_v58, 0.0  ;;  %p654_p3 = por %p653_p2, %p652_p1 }
  0xef   :  { %v188_v63 = vmax.f32 %v180_v59, 0.0 }
  0xf0   :  { %v194_v0 = vpack.c.bf16 %v190_v61, %v189_v60  ;;  %p655_p4 = pnand %p654_p3, %p648_p0 }
  0xf1   :  { %v193_v1 = vpack.c.bf16 %v188_v63, %v187_v62 }
  0xf3   :  { %620 = vmatprep.mubr.msk.bf16.mxu1 %vm234_vm1, %v193_v1 }
  0xf4   :  { %621 = vmatmul.mubr.msk.bf16.gmra.mrb[4].mxu1 %vm234_vm1, %v194_v0 }
 0x1bf   :  { %v618_v4 = vpop.f32.mrb[0].mxu1 }
 0x1c0   :  { %v290_v6 = vadd.f32 %v618_v4, %v519_v3  ;;  %v281_v7 = vpop.f32.mrb[1].mxu1 }
 0x1c1   :  { %v282_v9 = vadd.f32 %v519_v3, %v281_v7  ;;  %v619_v10 = vpop.f32.mrb[2].mxu1 }
 0x1c2   :  { %v321_v11 = vmul.f32 %v528_v5, %v290_v6  ;;  %v293_v12 = vadd.f32 %v619_v10, %v519_v3  ;;  %v284_v13 = vpop.f32.mrb[3].mxu1 }
 0x1c3   :  { %v319_v14 = vmul.f32 %v528_v5, %v282_v9  ;;  %v285_v15 = vadd.f32 %v519_v3, %v284_v13 }
 0x1c4   :  { %v336_v16 = vadd.f32 %v529_v8, %v321_v11  ;;  %v322_v17 = vmul.f32 %v528_v5, %v293_v12 }
 0x1c5   :  { %v334_v18 = vadd.f32 %v529_v8, %v319_v14  ;;  %v320_v19 = vmul.f32 %v528_v5, %v285_v15 }
 0x1c6   :  { %v337_v20 = vadd.f32 %v529_v8, %v322_v17  ;;  %v344_v23 = vmax.f32 %v336_v16, 0.0 }
 0x1c7   :  { %v335_v21 = vadd.f32 %v529_v8, %v320_v19  ;;  %v622_v22 = vpop.f32.mrb[4].mxu1  ;;  %v342_v27 = vmax.f32 %v334_v18, 0.0 }
 0x1c8   :  { %v345_v24 = vmax.f32 %v337_v20, 0.0  ;;  %v306_v25 = vadd.f32 %v622_v22, %v519_v3  ;;  %v297_v26 = vpop.f32.mrb[5].mxu1 }
 0x1c9   :  { %v343_v28 = vmax.f32 %v335_v21, 0.0  ;;  %v298_v29 = vadd.f32 %v519_v3, %v297_v26  ;;  %v623_v30 = vpop.f32.mrb[6].mxu1 }
 0x1ca   :  { %v351_v31 = vpack.c.bf16 %v345_v24, %v344_v23  ;;  %v325_v32 = vmul.f32 %v528_v5, %v306_v25  ;;  %v309_v33 = vadd.f32 %v623_v30, %v519_v3  ;;  %v300_v34 = vpop.f32.mrb[7].mxu1 }
 0x1cb   :  { %v350_v35 = vpack.c.bf16 %v343_v28, %v342_v27  ;;  %v323_v36 = vmul.f32 %v528_v5, %v298_v29  ;;  %v301_v37 = vadd.f32 %v519_v3, %v300_v34 }
 0x1cc   :  { %v340_v38 = vadd.f32 %v529_v8, %v325_v32  ;;  %v326_v39 = vmul.f32 %v528_v5, %v309_v33 }
 0x1cd   :  { %v338_v40 = vadd.f32 %v529_v8, %v323_v36  ;;  %v324_v41 = vmul.f32 %v528_v5, %v301_v37  ;;  %628 = vmatprep.mubr.msk.bf16.mxu0 %vm75_vm0, %v350_v35 }
 0x1ce   :  { %v341_v42 = vadd.f32 %v529_v8, %v326_v39  ;;  %629 = vmatmul.mubr.msk.bf16.vlgmr.msra.gmra.mrb[8].mxu0 %vm75_vm0, %v351_v31  ;;  %v348_v44 = vmax.f32 %v340_v38, 0.0 }
 0x1cf   :  { %v339_v43 = vadd.f32 %v529_v8, %v324_v41  ;;  %v346_v46 = vmax.f32 %v338_v40, 0.0 }
 0x1d0   :  { %v349_v45 = vmax.f32 %v341_v42, 0.0 }
 0x1d1   :  { %v347_v47 = vmax.f32 %v339_v43, 0.0 }
 0x1d2   :  { %v353_v48 = vpack.c.bf16 %v349_v45, %v348_v44 }
 0x1d3   :  { %v352_v49 = vpack.c.bf16 %v347_v47, %v346_v46 }
 0x1d5   :  { %632 = vmatprep.mubr.msk.bf16.mxu0 %vm75_vm0, %v352_v49 }
 0x1d6   :  { %633 = vmatmul.mubr.msk.bf16.gmra.mrb[12].mxu0 %vm75_vm0, %v353_v48 }
 0x2a1   :  { %v630_v50 = vpop.f32.mrb[8].mxu0 }
 0x2a2   :  { %v423_v52 = vpop.f32.mrb[9].mxu0  ;;  %v432_v54 = vadd.f32 %v630_v50, %v530_v51 }
 0x2a3   :  { %v631_v53 = vpop.f32.mrb[10].mxu0  ;;  %v424_v57 = vadd.f32 %v530_v51, %v423_v52 }
 0x2a4   :  { %v435_v55 = vadd.f32 %v631_v53, %v530_v51  ;;  %v426_v56 = vpop.f32.mrb[11].mxu0 }
 0x2a5   :  { %v427_v58 = vadd.f32 %v530_v51, %v426_v56 }
 0x2a6   :  { %v561_v59 = vpack.c.bf16 %v435_v55, %v432_v54 }
 0x2a7   :  { %v556_v60 = vpack.c.bf16 %v427_v58, %v424_v57 }
 0x2a8   :  { %573 = vst [vmem:[#allocation2 + $0x8] sm:$0xff] %v561_v59  }
 0x2a9   :  { %557 = vst [vmem:[#allocation2] sm:$0xff] %v556_v60   ;;  %v634_v61 = vpop.f32.mrb[12].mxu0 }
 0x2aa   :  { %v439_v62 = vpop.f32.mrb[13].mxu0  ;;  %v448_v0 = vadd.f32 %v634_v61, %v530_v51 }
 0x2ab   :  { %v635_v63 = vpop.f32.mrb[14].mxu0  ;;  %v440_v3 = vadd.f32 %v530_v51, %v439_v62 }
 0x2ac   :  { %v451_v1 = vadd.f32 %v635_v63, %v530_v51  ;;  %v442_v2 = vpop.f32.mrb[15].mxu0 }
 0x2ad   :  { %v443_v4 = vadd.f32 %v530_v51, %v442_v2 }
 0x2ae   :  { %v571_v5 = vpack.c.bf16 %v451_v1, %v448_v0 }
 0x2af   :  { %v566_v6 = vpack.c.bf16 %v443_v4, %v440_v3 }
 0x2b0   :  { %575 = vst [vmem:[#allocation2 + $0x18] sm:$0xff] %v571_v5  }
 0x2b1   :  { %574 = vst [vmem:[#allocation2 + $0x10] sm:$0xff] %v566_v6  }
 0x2b2   :  { %658 = shalt.err (!%p655_p4)
}
 0x2b3   :  { %s659_s18 = scalar_lea.hbm %s838_s11, 512 }
 0x2b4   :  { %p660_p5 = scmp.ne.s32.totalorder %s838_s11, %s659_s18  ;;  %p663_p6 = scmp.lt.u32.totalorder %s659_s18, %s838_s11 }
 0x2b6   :  { %p665_p7 = pnand %p663_p6, %p660_p5 }
 0x2b8   :  { %668 = shalt.err (!%p665_p7)
}
 0x2b9   :  { %s672_s23 = smov 64   ;;  %s673_s24 = smov 4  }
 0x2ba   :  { %505 = dma.vmem_to_hbm [thread:$0]  %s500_s9, 512, %s838_s11, [#allocation3], %s672_s23, %s672_s23, %s673_s24  }
 0x2bb   :  { %669 = dma.done.wait [#allocation3], 512  }
 0x2bc   :  { %670 = vsyncadd [#allocation3], 4294966784 }
 0x2bd   :  { %509 = vsyncpa [#allocation3], 1 }

</bundles_post_ra>
